<compile_context>
chip_gen: v6e
topology: v6e:2x2x1
jax: 0.10.0
libtpu: 0.0.40
codegen_flags: <defaults>
</compile_context>

<pallas_src>
import numpy as np
import jax
import jax.numpy as jnp
from jax.experimental import pallas as pl
from jax.experimental.pallas import tpu as pltpu

TQ = 128    # queries per output tile (lane dim of the output -> multiple of 128)
TYX = 256   # flattened-grid rows (Y*X) per reduction step


def _interp_kernel(idx_ref, w_ref, z_ref, o_ref):
    # idx_ref: [4, TQ]  int32  flat Y*X corner indices for this query block
    # w_ref  : [4, TQ]  f32    bilinear corner weights
    # z_ref  : [C, TYX] f32    field chunk j (channels-major)
    # o_ref  : [C, TQ]  f32    output tile, resident across the chunk (j) axis
    tq = idx_ref.shape[1]
    tyx = z_ref.shape[1]
    j = pl.program_id(1)

    @pl.when(j == 0)
    def _():
        o_ref[...] = jnp.zeros_like(o_ref)

    idx = idx_ref[...]
    w = w_ref[...]

    # Weighted one-hot scatter matrix:
    #   S[r, q] = sum_k w[k, q] * (idx[k, q] == j*TYX + r)
    row_ids = jax.lax.broadcasted_iota(jnp.int32, (tyx, tq), 0) + j * tyx
    scatter = jnp.zeros((tyx, tq), jnp.float32)
    for k in range(4):
        scatter = scatter + jnp.where(row_ids == idx[k:k + 1, :],
                                      w[k:k + 1, :], 0.0)

    # [C, TYX] @ [TYX, TQ] -> [C, TQ] on the MXU; accumulate over field chunks.
    o_ref[...] += jnp.dot(z_ref[...], scatter, preferred_element_type=jnp.float32)


def bilinear_forward(z, index, weights, *, tq=TQ, tyx=TYX):
    """Equivalent of:
       embedding_bag(index, z.view(-1, Y*X).T, per_sample_weights=weights,
                     mode='sum').T.view(*lead, N)
       computed channels-major end-to-end (no full-field transposes)."""
    *lead, Yd, Xd = z.shape
    N = index.shape[0]
    C = int(np.prod(lead)) if lead else 1
    YX = Yd * Xd

    Npad = -(-N // tq) * tq
    YXpad = -(-YX // tyx) * tyx
    Cpad = max(8, -(-C // 8) * 8)        # sublane-align the channel axis

    # channels-major field, zero-padded (no transpose of the big array needed)
    zflat = z.reshape(C, YX).astype(jnp.float32)
    z_p = jnp.zeros((Cpad, YXpad), jnp.float32).at[:C, :YX].set(zflat)

    # corner indices / weights as [4, Npad]; padded queries: idx 0, weight 0
    idx_p = jnp.zeros((4, Npad), jnp.int32).at[:, :N].set(index.astype(jnp.int32).T)
    w_p = jnp.zeros((4, Npad), jnp.float32).at[:, :N].set(weights.astype(jnp.float32).T)

    out = pl.pallas_call(
        _interp_kernel,
        out_shape=jax.ShapeDtypeStruct((Cpad, Npad), jnp.float32),
        grid=(Npad // tq, YXpad // tyx),
        in_specs=[
            pl.BlockSpec((4, tq), lambda i, j: (0, i)),        # indices
            pl.BlockSpec((4, tq), lambda i, j: (0, i)),        # weights
            pl.BlockSpec((Cpad, tyx), lambda i, j: (0, j)),    # field chunk
        ],
        out_specs=pl.BlockSpec((Cpad, tq), lambda i, j: (0, i)),
        compiler_params=pltpu.CompilerParams(
            dimension_semantics=("parallel", "arbitrary"),
            vmem_limit_bytes=32 * 1024 * 1024,
        ),
    )(idx_p, w_p, z_p)

    # TODO(synk): for very large Y*X (>> 16K rows) a DMA-gather path would beat
    # the dense one-hot matmul; not needed at these sizes.
    return out[:C, :N].reshape(*lead, N).astype(z.dtype)


class BilinearInterpolator:
    """Bilinear interpolation for a non-uniform grid (JAX/Pallas port)."""

    def __init__(self, x_coords, y_coords, x_query, y_query):
        # __init__ precompute (searchsorted / weights) is glue -> plain JAX.
        x_coords = jnp.asarray(x_coords, jnp.float32)
        y_coords = jnp.asarray(y_coords, jnp.float32)
        x_query = jnp.asarray(x_query, jnp.float32)
        y_query = jnp.asarray(y_query, jnp.float32)
        W = x_coords.shape[0]
        H = y_coords.shape[0]

        x_l_idx = jnp.searchsorted(x_coords, x_query, side="right") - 1
        x_u_idx = x_l_idx + 1
        y_l_idx = jnp.searchsorted(y_coords, y_query, side="right") - 1
        y_u_idx = y_l_idx + 1
        x_l_idx = jnp.clip(x_l_idx, 0, W - 2)
        x_u_idx = jnp.clip(x_u_idx, 1, W - 1)
        y_l_idx = jnp.clip(y_l_idx, 0, H - 2)
        y_u_idx = jnp.clip(y_u_idx, 1, H - 1)

        x_l_w = (x_coords[x_u_idx] - x_query) / (x_coords[x_u_idx] - x_coords[x_l_idx])
        x_u_w = (x_query - x_coords[x_l_idx]) / (x_coords[x_u_idx] - x_coords[x_l_idx])
        y_l_w = (y_coords[y_u_idx] - y_query) / (y_coords[y_u_idx] - y_coords[y_l_idx])
        y_u_w = (y_query - y_coords[y_l_idx]) / (y_coords[y_u_idx] - y_coords[y_l_idx])

        self.weights = jnp.stack(
            [x_l_w * y_l_w, x_u_w * y_l_w, x_l_w * y_u_w, x_u_w * y_u_w], axis=-1
        ).astype(jnp.float32)
        stride = W
        self.index = jnp.stack(
            [x_l_idx + stride * y_l_idx, x_u_idx + stride * y_l_idx,
             x_l_idx + stride * y_u_idx, x_u_idx + stride * y_u_idx], axis=-1
        ).astype(jnp.int32)

    def __call__(self, z):
        return bilinear_forward(z, self.index, self.weights)


if __name__ == "__main__":
    key = jax.random.PRNGKey(0)
    k1, k2, k3, k4, k5 = jax.random.split(key, 5)

    H, W = 16, 16       # input grid
    B, Ch = 2, 4        # leading dims of the field
    N = 64              # number of query points

    # strictly increasing non-uniform coordinates
    x_coords = jnp.cumsum(jax.random.uniform(k1, (W,), minval=0.5, maxval=1.5))
    y_coords = jnp.cumsum(jax.random.uniform(k2, (H,), minval=0.5, maxval=1.5))
    x_query = jax.random.uniform(
        k3, (N,), minval=float(x_coords[0]), maxval=float(x_coords[-1]))
    y_query = jax.random.uniform(
        k4, (N,), minval=float(y_coords[0]), maxval=float(y_coords[-1]))

    interp = BilinearInterpolator(x_coords, y_coords, x_query, y_query)

    z = jax.random.normal(k5, (B, Ch, H, W), dtype=jnp.float32)
    out = jax.block_until_ready(interp(z))
    assert out.shape == (B, Ch, N), out.shape

    # pure-JAX reference of embedding_bag(mode='sum') semantics
    zrs = z.reshape(B * Ch, H * W).T                     # [Y*X, C]
    ref = jnp.einsum("nk,nkc->nc", interp.weights, zrs[interp.index])
    ref = ref.T.reshape(B, Ch, N)
    np.testing.assert_allclose(np.asarray(out), np.asarray(ref),
                               rtol=1e-5, atol=1e-5)
    print("KERNEL_OK")
</pallas_src>

<mosaic_0001>
module attributes {stable_mosaic.version = 11 : i64} {
  func.func @_interp_kernel(%arg0: i32, %arg1: i32, %arg2: memref<4x128xi32, #tpu.memory_space<vmem>>, %arg3: memref<4x128xf32, #tpu.memory_space<vmem>>, %arg4: memref<8x256xf32, #tpu.memory_space<vmem>>, %arg5: memref<8x128xf32, #tpu.memory_space<vmem>>) attributes {dimension_semantics = [#tpu.dimension_semantics<parallel>, #tpu.dimension_semantics<arbitrary>], iteration_bounds = array<i64: 1, 1>, scalar_prefetch = 0 : i64, scratch_operands = 0 : i64, tpu.core_type = #tpu.core_type<tc>, window_params = [{transform_indices = @transform_0, window_bounds = array<i64: 4, 128>}, {transform_indices = @transform_1, window_bounds = array<i64: 4, 128>}, {transform_indices = @transform_2, window_bounds = array<i64: 8, 256>}, {transform_indices = @transform_3, window_bounds = array<i64: 8, 128>}]} {
    %c0_i32 = arith.constant 0 : i32
    %0 = arith.cmpi eq, %arg1, %c0_i32 : i32
    %1 = arith.extui %0 : i1 to i32
    %c0_i32_0 = arith.constant 0 : i32
    %2 = arith.cmpi ne, %1, %c0_i32_0 : i32
    scf.if %2 {
      %cst_15 = arith.constant 0.000000e+00 : f32
      %51 = vector.broadcast %cst_15 : f32 to vector<8x128xf32>
      %c0_16 = arith.constant 0 : index
      %c0_17 = arith.constant 0 : index
      %52 = vector.load %arg5[%c0_16, %c0_17] : memref<8x128xf32, #tpu.memory_space<vmem>>, vector<8x128xf32>
      tpu.vector_store %arg5[%c0_16, %c0_17], %51 {strides = array<i32>} : memref<8x128xf32, #tpu.memory_space<vmem>>, vector<8x128xf32>,
    } else {
    }
    %c0 = arith.constant 0 : index
    %c0_1 = arith.constant 0 : index
    %3 = vector.load %arg2[%c0, %c0_1] : memref<4x128xi32, #tpu.memory_space<vmem>>, vector<4x128xi32>
    %c0_2 = arith.constant 0 : index
    %c0_3 = arith.constant 0 : index
    %4 = vector.load %arg3[%c0_2, %c0_3] : memref<4x128xf32, #tpu.memory_space<vmem>>, vector<4x128xf32>
    %5 = tpu.iota {dimensions = array<i32: 0>} : vector<256x128xi32>
    %c256_i32 = arith.constant 256 : i32
    %6 = arith.muli %arg1, %c256_i32 : i32
    %7 = vector.broadcast %6 : i32 to vector<256x128xi32>
    %8 = arith.addi %5, %7 : vector<256x128xi32>
    %cst = arith.constant 0.000000e+00 : f32
    %9 = vector.broadcast %cst : f32 to vector<256x128xf32>
    %10 = vector.extract_strided_slice %3 {offsets = [0, 0], sizes = [1, 128], strides = [1, 1]} : vector<4x128xi32> to vector<1x128xi32>
    %11 = vector.broadcast %10 : vector<1x128xi32> to vector<256x128xi32>
    %12 = arith.cmpi eq, %8, %11 : vector<256x128xi32>
    %13 = vector.extract_strided_slice %4 {offsets = [0, 0], sizes = [1, 128], strides = [1, 1]} : vector<4x128xf32> to vector<1x128xf32>
    %cst_4 = arith.constant 0.000000e+00 : f32
    %14 = vector.shape_cast %13 : vector<1x128xf32> to vector<1x128xf32>
    %15 = vector.broadcast %14 : vector<1x128xf32> to vector<256x128xf32>
    %16 = vector.broadcast %cst_4 : f32 to vector<256x128xf32>
    %17 = arith.select %12, %15, %16 : vector<256x128xi1>, vector<256x128xf32>
    %18 = arith.addf %9, %17 : vector<256x128xf32>
    %19 = vector.extract_strided_slice %3 {offsets = [1, 0], sizes = [1, 128], strides = [1, 1]} : vector<4x128xi32> to vector<1x128xi32>
    %20 = vector.broadcast %19 : vector<1x128xi32> to vector<256x128xi32>
    %21 = arith.cmpi eq, %8, %20 : vector<256x128xi32>
    %22 = vector.extract_strided_slice %4 {offsets = [1, 0], sizes = [1, 128], strides = [1, 1]} : vector<4x128xf32> to vector<1x128xf32>
    %cst_5 = arith.constant 0.000000e+00 : f32
    %23 = vector.shape_cast %22 : vector<1x128xf32> to vector<1x128xf32>
    %24 = vector.broadcast %23 : vector<1x128xf32> to vector<256x128xf32>
    %25 = vector.broadcast %cst_5 : f32 to vector<256x128xf32>
    %26 = arith.select %21, %24, %25 : vector<256x128xi1>, vector<256x128xf32>
    %27 = arith.addf %18, %26 : vector<256x128xf32>
    %28 = vector.extract_strided_slice %3 {offsets = [2, 0], sizes = [1, 128], strides = [1, 1]} : vector<4x128xi32> to vector<1x128xi32>
    %29 = vector.broadcast %28 : vector<1x128xi32> to vector<256x128xi32>
    %30 = arith.cmpi eq, %8, %29 : vector<256x128xi32>
    %31 = vector.extract_strided_slice %4 {offsets = [2, 0], sizes = [1, 128], strides = [1, 1]} : vector<4x128xf32> to vector<1x128xf32>
    %cst_6 = arith.constant 0.000000e+00 : f32
    %32 = vector.shape_cast %31 : vector<1x128xf32> to vector<1x128xf32>
    %33 = vector.broadcast %32 : vector<1x128xf32> to vector<256x128xf32>
    %34 = vector.broadcast %cst_6 : f32 to vector<256x128xf32>
    %35 = arith.select %30, %33, %34 : vector<256x128xi1>, vector<256x128xf32>
    %36 = arith.addf %27, %35 : vector<256x128xf32>
    %37 = vector.extract_strided_slice %3 {offsets = [3, 0], sizes = [1, 128], strides = [1, 1]} : vector<4x128xi32> to vector<1x128xi32>
    %38 = vector.broadcast %37 : vector<1x128xi32> to vector<256x128xi32>
    %39 = arith.cmpi eq, %8, %38 : vector<256x128xi32>
    %40 = vector.extract_strided_slice %4 {offsets = [3, 0], sizes = [1, 128], strides = [1, 1]} : vector<4x128xf32> to vector<1x128xf32>
    %cst_7 = arith.constant 0.000000e+00 : f32
    %41 = vector.shape_cast %40 : vector<1x128xf32> to vector<1x128xf32>
    %42 = vector.broadcast %41 : vector<1x128xf32> to vector<256x128xf32>
    %43 = vector.broadcast %cst_7 : f32 to vector<256x128xf32>
    %44 = arith.select %39, %42, %43 : vector<256x128xi1>, vector<256x128xf32>
    %45 = arith.addf %36, %44 : vector<256x128xf32>
    %c0_8 = arith.constant 0 : index
    %c0_9 = arith.constant 0 : index
    %46 = vector.load %arg5[%c0_8, %c0_9] : memref<8x128xf32, #tpu.memory_space<vmem>>, vector<8x128xf32>
    %c0_10 = arith.constant 0 : index
    %c0_11 = arith.constant 0 : index
    %47 = vector.load %arg4[%c0_10, %c0_11] : memref<8x256xf32, #tpu.memory_space<vmem>>, vector<8x256xf32>
    %cst_12 = arith.constant dense<0.000000e+00> : vector<8x128xf32>
    %48 = tpu.matmul %47, %45, %cst_12 {dimension_numbers = #tpu.dot_dimension_numbers<[1], [0], [0], [1], [0, 0, 1, 1], [], []>} : vector<8x256xf32>, vector<256x128xf32>, vector<8x128xf32> -> vector<8x128xf32>
    %49 = arith.addf %46, %48 : vector<8x128xf32>
    %c0_13 = arith.constant 0 : index
    %c0_14 = arith.constant 0 : index
    %50 = vector.load %arg5[%c0_13, %c0_14] : memref<8x128xf32, #tpu.memory_space<vmem>>, vector<8x128xf32>
    tpu.vector_store %arg5[%c0_13, %c0_14], %49 {strides = array<i32>} : memref<8x128xf32, #tpu.memory_space<vmem>>, vector<8x128xf32>,
    return
  }
  func.func @transform_0(%arg0: i32, %arg1: i32) -> (i32, i32) {
    %c0_i32 = arith.constant 0 : i32
    %c0_i32_0 = arith.constant 0 : i32
    return %c0_i32, %arg0 : i32, i32
  }
  func.func @transform_1(%arg0: i32, %arg1: i32) -> (i32, i32) {
    %c0_i32 = arith.constant 0 : i32
    %c0_i32_0 = arith.constant 0 : i32
    return %c0_i32, %arg0 : i32, i32
  }
  func.func @transform_2(%arg0: i32, %arg1: i32) -> (i32, i32) {
    %c0_i32 = arith.constant 0 : i32
    %c0_i32_0 = arith.constant 0 : i32
    return %c0_i32, %arg1 : i32, i32
  }
  func.func @transform_3(%arg0: i32, %arg1: i32) -> (i32, i32) {
    %c0_i32 = arith.constant 0 : i32
    %c0_i32_0 = arith.constant 0 : i32
    return %c0_i32, %arg0 : i32, i32
  }
}

</mosaic_0001>

<bundles_post_ra>
// kernel: tpu_custom_call.1
= control target key start
LH: loop header
LB: loop body
LE: loop exit
PB: predicated region body
PF: predicated region fallthrough
CT: control target
= control target key end

     0   :  { %8 = vsyncpa [#allocation3], 0  ;;  %s1142_s0 = inlined_call_operand.hbm [shape: s32[4,128], index: 0, kind: input, shape index: {}]   ;;  %s1143_s1 = inlined_call_operand.hbm [shape: f32[4,128], index: 1, kind: input, shape index: {}]   ;;  %s1144_s2 = inlined_call_operand.hbm [shape: f32[8,256], index: 2, kind: input, shape index: {}]   ;;  %s1145_s3 = inlined_call_operand.hbm [shape: f32[8,128], index: 3, kind: output, shape index: {}]  }
   0x1   :  { %9 = vsyncpa [#allocation6], 0 }
   0x2   :  { %10 = vsyncpa [#allocation4], 0  ;;  %s757_s12 = smov [#allocation5]   ;;  %s758_s14 = smov [#allocation2]  }
   0x3   :  { %s27_s13 = sshll.u32 %s757_s12, 4  ;;  %s17_s15 = sshll.u32 %s758_s14, 4  ;;  %s28_s13 = int_to_ptr.vmem [resolvable:$true] %s27_s13  ;;  %s18_s15 = int_to_ptr.vmem [resolvable:$true] %s17_s15 }
   0x4   :  { %s679_s16 = scalar_lea.vmem %s28_s13, 64  ;;  %p684_p1 = scmp.lt.s32.totalorder %s28_s13, %s28_s13 }
   0x5   :  { %p680_p0 = scmp.ne.s32.totalorder %s28_s13, %s679_s16  ;;  %p685_p2 = scmp.lt.s32.totalorder %s679_s16, %s679_s16 }
   0x7   :  { %p686_p3 = por %p685_p2, %p684_p1 }
   0x9   :  { %p687_p4 = pnand %p686_p3, %p680_p0 }
   0xb   :  { %690 = shalt.err (!%p687_p4)
}
   0xc   :  { %30 = dma.hbm_to_vmem [thread:$0]  %s1143_s1, 64, %s28_s13, [#allocation6]  }
   0xd   :  { %s699_s19 = scalar_lea.vmem %s18_s15, 64  ;;  %p704_p6 = scmp.lt.s32.totalorder %s18_s15, %s18_s15 }
   0xe   :  { %p700_p5 = scmp.ne.s32.totalorder %s18_s15, %s699_s19  ;;  %p705_p7 = scmp.lt.s32.totalorder %s699_s19, %s699_s19 }
  0x10   :  { %p706_p8 = por %p705_p7, %p704_p6 }
  0x12   :  { %p707_p9 = pnand %p706_p8, %p700_p5 }
  0x14   :  { %710 = shalt.err (!%p707_p9)
}
  0x15   :  { %20 = dma.hbm_to_vmem [thread:$0]  %s1142_s0, 64, %s18_s15, [#allocation3]  }
  0x16   :  { %s759_s22 = smov [#allocation7]  }
  0x17   :  { %s37_s23 = sshll.u32 %s759_s22, 4  ;;  %s38_s23 = int_to_ptr.vmem [resolvable:$true] %s37_s23 }
  0x18   :  { %s719_s24 = scalar_lea.vmem %s38_s23, 256  ;;  %p724_p11 = scmp.lt.s32.totalorder %s38_s23, %s38_s23 }
  0x19   :  { %p720_p10 = scmp.ne.s32.totalorder %s38_s23, %s719_s24  ;;  %p725_p12 = scmp.lt.s32.totalorder %s719_s24, %s719_s24 }
  0x1b   :  { %p726_p13 = por %p725_p12, %p724_p11 }
  0x1d   :  { %p727_p0 = pnand %p726_p13, %p720_p10 }
  0x1f   :  { %730 = shalt.err (!%p727_p0)
}
  0x20   :  { %40 = dma.hbm_to_vmem [thread:$0]  %s1144_s2, 256, %s38_s23, [#allocation6]  }
  0x21   :  { %751 = dma.done.wait [#allocation3], 64  }
  0x22   :  { %752 = vsyncadd [#allocation3], 4294967232 }
  0x23   :  { %753 = dma.done.wait [#allocation6], 320  }
  0x24   :  { %754 = vsyncadd [#allocation6], 4294966976  ;;  %v57_v0 = vlaneseq  ;;  %v55_v14 = vld [vmem:[#allocation2] sm:$0xf]  ;;  %v56_v15 = vld [vmem:[#allocation5] sm:$0xf] }
  0x25   :  { %v542_v22 = vld [vmem:[#allocation7 + $0x8] sm:$0xff]  ;;  %s760_s0 = smov [#allocation8]  }
  0x26   :  { %v790_v1 = vshrl.u32 %v57_v0, 7  ;;  %607 = vmatprep.mubr.f32.mxu0 %v542_v22  ;;  %s621_s2 = sshll.u32 %s760_s0, 4  ;;  %s622_s2 = int_to_ptr.vmem [resolvable:$true] %s621_s2 }
  0x27   :  { %s731_s26 = scalar_lea.vmem %s622_s2, 128  ;;  %p736_p2 = scmp.lt.s32.totalorder %s622_s2, %s622_s2 }
  0x28   :  { %v126_v2 = vsub.s32 0, %v790_v1  ;;  %v230_v3 = vsub.s32 1, %v790_v1  ;;  %v334_v4 = vsub.s32 2, %v790_v1  ;;  %v438_v5 = vsub.s32 3, %v790_v1  ;;  %p732_p1 = scmp.ne.s32.totalorder %s622_s2, %s731_s26  ;;  %p737_p3 = scmp.lt.s32.totalorder %s731_s26, %s731_s26 }
  0x29   :  { %v89_v6 = vadd.s32 248, %v790_v1  ;;  %v73_v7 = vadd.s32 120, %v790_v1  ;;  %v88_v8 = vadd.s32 240, %v790_v1  ;;  %v72_v9 = vadd.s32 112, %v790_v1 }
  0x2a   :  { %v801_v10 = vadd.s32 232, %v790_v1  ;;  %v804_v11 = vadd.s32 104, %v790_v1  ;;  %v807_v12 = vadd.s32 224, %v790_v1  ;;  %v810_v13 = vadd.s32 96, %v790_v1  ;;  %p738_p4 = por %p737_p3, %p736_p2 }
  0x2b   :  { %v813_v16 = vadd.s32 216, %v790_v1  ;;  %v816_v17 = vadd.s32 88, %v790_v1  ;;  %v818_v18 = vrot.slane %v55_v14, %v126_v2  ;;  %v820_v19 = vrot.slane %v56_v15, %v126_v2 }
  0x2c   :  { %v822_v20 = vrot.slane %v55_v14, %v230_v3  ;;  %v824_v21 = vrot.slane %v56_v15, %v230_v3  ;;  %v826_v23 = vrot.slane %v55_v14, %v334_v4  ;;  %v828_v24 = vrot.slane %v56_v15, %v334_v4  ;;  %p739_p5 = pnand %p738_p4, %p732_p1 }
  0x2d   :  { %v830_v25 = vrot.slane %v55_v14, %v438_v5  ;;  %v832_v26 = vrot.slane %v56_v15, %v438_v5  ;;  %vm159_vm0 = vcmp.eq.s32.totalorder %v89_v6, %v818_v18  ;;  %vm143_vm2 = vcmp.eq.s32.totalorder %v73_v7, %v818_v18 }
  0x2e   :  { %vm263_vm1 = vcmp.eq.s32.totalorder %v89_v6, %v822_v20  ;;  %vm247_vm3 = vcmp.eq.s32.totalorder %v73_v7, %v822_v20  ;;  %v195_v27 = vsel %vm159_vm0, %v820_v19, 0.0  ;;  %vm367_vm4 = vcmp.eq.s32.totalorder %v89_v6, %v826_v23 }
  0x2f   :  { %v299_v28 = vsel %vm263_vm1, %v824_v21, 0.0  ;;  %vm471_vm5 = vcmp.eq.s32.totalorder %v89_v6, %v830_v25  ;;  %v403_v30 = vsel %vm367_vm4, %v828_v24, 0.0  ;;  %v179_v32 = vsel %vm143_vm2, %v820_v19, 0.0 }
  0x30   :  { %v331_v29 = vadd.f32 %v299_v28, %v195_v27  ;;  %v507_v31 = vsel %vm471_vm5, %v832_v26, 0.0  ;;  %v283_v33 = vsel %vm247_vm3, %v824_v21, 0.0  ;;  %vm351_vm6 = vcmp.eq.s32.totalorder %v73_v7, %v826_v23 }
  0x31   :  { %vm455_vm7 = vcmp.eq.s32.totalorder %v73_v7, %v830_v25  ;;  %vm158_vm8 = vcmp.eq.s32.totalorder %v88_v8, %v818_v18  ;;  %v315_v35 = vadd.f32 %v283_v33, %v179_v32  ;;  %v387_v36 = vsel %vm351_vm6, %v828_v24, 0.0 }
  0x32   :  { %v435_v34 = vadd.f32 %v403_v30, %v331_v29  ;;  %v491_v37 = vsel %vm455_vm7, %v832_v26, 0.0  ;;  %v194_v38 = vsel %vm158_vm8, %v820_v19, 0.0  ;;  %vm262_vm9 = vcmp.eq.s32.totalorder %v88_v8, %v822_v20 }
  0x33   :  { %vm366_vm10 = vcmp.eq.s32.totalorder %v88_v8, %v826_v23  ;;  %vm470_vm11 = vcmp.eq.s32.totalorder %v88_v8, %v830_v25  ;;  %v419_v40 = vadd.f32 %v387_v36, %v315_v35  ;;  %v298_v41 = vsel %vm262_vm9, %v824_v21, 0.0 }
  0x34   :  { %v539_v39 = vadd.f32 %v507_v31, %v435_v34  ;;  %v402_v42 = vsel %vm366_vm10, %v828_v24, 0.0  ;;  %v330_v43 = vadd.f32 %v298_v41, %v194_v38  ;;  %v506_v44 = vsel %vm470_vm11, %v832_v26, 0.0 }
  0x35   :  { %vm142_vm12 = vcmp.eq.s32.totalorder %v72_v9, %v818_v18  ;;  %vm246_vm13 = vcmp.eq.s32.totalorder %v72_v9, %v822_v20  ;;  %v523_v45 = vadd.f32 %v491_v37, %v419_v40  ;;  %vm350_vm14 = vcmp.eq.s32.totalorder %v72_v9, %v826_v23 }
  0x36   :  { %631 = vmatprep.subr.mxu0 %v539_v39  ;;  %v178_v46 = vsel %vm142_vm12, %v820_v19, 0.0  ;;  %v282_v47 = vsel %vm246_vm13, %v824_v21, 0.0  ;;  %v434_v48 = vadd.f32 %v402_v42, %v330_v43  ;;  %v386_v50 = vsel %vm350_vm14, %v828_v24, 0.0 }
  0x37   :  { %v314_v49 = vadd.f32 %v282_v47, %v178_v46  ;;  %vm454_vm15 = vcmp.eq.s32.totalorder %v72_v9, %v830_v25  ;;  %632 = vmatpush3.msra.mxu0 %v523_v45  ;;  %vm157_vm0 = vcmp.eq.s32.totalorder %v801_v10, %v818_v18  ;;  %vm261_vm1 = vcmp.eq.s32.totalorder %v801_v10, %v822_v20 }
  0x38   :  { %v490_v51 = vsel %vm454_vm15, %v832_v26, 0.0  ;;  %vm365_vm2 = vcmp.eq.s32.totalorder %v801_v10, %v826_v23  ;;  %v538_v52 = vadd.f32 %v506_v44, %v434_v48  ;;  %v193_v54 = vsel %vm157_vm0, %v820_v19, 0.0 }
  0x39   :  { %v418_v53 = vadd.f32 %v386_v50, %v314_v49  ;;  %v297_v55 = vsel %vm261_vm1, %v824_v21, 0.0  ;;  %v401_v57 = vsel %vm365_vm2, %v828_v24, 0.0  ;;  %vm469_vm3 = vcmp.eq.s32.totalorder %v801_v10, %v830_v25 }
  0x3a   :  { %v329_v56 = vadd.f32 %v297_v55, %v193_v54  ;;  %vm141_vm4 = vcmp.eq.s32.totalorder %v804_v11, %v818_v18  ;;  %633 = vmatprep.subr.mxu0 %v538_v52  ;;  %v505_v59 = vsel %vm469_vm3, %v832_v26, 0.0  ;;  %vm245_vm5 = vcmp.eq.s32.totalorder %v804_v11, %v822_v20 }
  0x3b   :  { %v522_v58 = vadd.f32 %v490_v51, %v418_v53  ;;  %v177_v60 = vsel %vm141_vm4, %v820_v19, 0.0  ;;  %v281_v62 = vsel %vm245_vm5, %v824_v21, 0.0  ;;  %vm349_vm6 = vcmp.eq.s32.totalorder %v804_v11, %v826_v23 }
  0x3c   :  { %v433_v61 = vadd.f32 %v401_v57, %v329_v56  ;;  %vm453_vm7 = vcmp.eq.s32.totalorder %v804_v11, %v830_v25  ;;  %v313_v63 = vadd.f32 %v281_v62, %v177_v60  ;;  %v385_v0 = vsel %vm349_vm6, %v828_v24, 0.0 }
  0x3d   :  { %634 = vmatpush3.msra.mxu0 %v522_v58  ;;  %v489_v2 = vsel %vm453_vm7, %v832_v26, 0.0  ;;  %vm156_vm8 = vcmp.eq.s32.totalorder %v807_v12, %v818_v18  ;;  %vm260_vm9 = vcmp.eq.s32.totalorder %v807_v12, %v822_v20  ;;  %vm364_vm10 = vcmp.eq.s32.totalorder %v807_v12, %v826_v23 }
  0x3e   :  { %v537_v3 = vadd.f32 %v505_v59, %v433_v61  ;;  %v192_v4 = vsel %vm156_vm8, %v820_v19, 0.0  ;;  %v417_v5 = vadd.f32 %v385_v0, %v313_v63  ;;  %v296_v6 = vsel %vm260_vm9, %v824_v21, 0.0 }
  0x3f   :  { %v400_v7 = vsel %vm364_vm10, %v828_v24, 0.0  ;;  %vm468_vm11 = vcmp.eq.s32.totalorder %v807_v12, %v830_v25  ;;  %v328_v8 = vadd.f32 %v296_v6, %v192_v4  ;;  %vm140_vm12 = vcmp.eq.s32.totalorder %v810_v13, %v818_v18 }
  0x40   :  { %635 = vmatprep.subr.mxu0 %v537_v3  ;;  %v504_v9 = vsel %vm468_vm11, %v832_v26, 0.0  ;;  %vm244_vm13 = vcmp.eq.s32.totalorder %v810_v13, %v822_v20  ;;  %v521_v10 = vadd.f32 %v489_v2, %v417_v5  ;;  %v176_v11 = vsel %vm140_vm12, %v820_v19, 0.0 }
  0x41   :  { %v280_v14 = vsel %vm244_vm13, %v824_v21, 0.0  ;;  %vm348_vm14 = vcmp.eq.s32.totalorder %v810_v13, %v826_v23  ;;  %v432_v15 = vadd.f32 %v400_v7, %v328_v8  ;;  %vm452_vm15 = vcmp.eq.s32.totalorder %v810_v13, %v830_v25 }
  0x42   :  { %v312_v12 = vadd.f32 %v280_v14, %v176_v11  ;;  %v384_v22 = vsel %vm348_vm14, %v828_v24, 0.0  ;;  %636 = vmatpush3.msra.mxu0 %v521_v10  ;;  %v488_v27 = vsel %vm452_vm15, %v832_v26, 0.0  ;;  %vm155_vm0 = vcmp.eq.s32.totalorder %v813_v16, %v818_v18 }
  0x43   :  { %vm259_vm1 = vcmp.eq.s32.totalorder %v813_v16, %v822_v20  ;;  %vm363_vm2 = vcmp.eq.s32.totalorder %v813_v16, %v826_v23  ;;  %v536_v28 = vadd.f32 %v504_v9, %v432_v15  ;;  %v191_v30 = vsel %vm155_vm0, %v820_v19, 0.0 }
  0x44   :  { %v416_v29 = vadd.f32 %v384_v22, %v312_v12  ;;  %v295_v31 = vsel %vm259_vm1, %v824_v21, 0.0  ;;  %v399_v13 = vsel %vm363_vm2, %v828_v24, 0.0  ;;  %vm467_vm3 = vcmp.eq.s32.totalorder %v813_v16, %v830_v25 }
  0x45   :  { %v327_v32 = vadd.f32 %v295_v31, %v191_v30  ;;  %vm139_vm4 = vcmp.eq.s32.totalorder %v816_v17, %v818_v18  ;;  %637 = vmatprep.subr.mxu0 %v536_v28  ;;  %v503_v34 = vsel %vm467_vm3, %v832_v26, 0.0  ;;  %vm243_vm5 = vcmp.eq.s32.totalorder %v816_v17, %v822_v20 }
  0x46   :  { %v520_v33 = vadd.f32 %v488_v27, %v416_v29  ;;  %v175_v35 = vsel %vm139_vm4, %v820_v19, 0.0  ;;  %v279_v37 = vsel %vm243_vm5, %v824_v21, 0.0  ;;  %vm347_vm6 = vcmp.eq.s32.totalorder %v816_v17, %v826_v23 }
  0x47   :  { %v431_v36 = vadd.f32 %v399_v13, %v327_v32  ;;  %vm451_vm7 = vcmp.eq.s32.totalorder %v816_v17, %v830_v25  ;;  %v311_v16 = vadd.f32 %v279_v37, %v175_v35  ;;  %v383_v38 = vsel %vm347_vm6, %v828_v24, 0.0 }
  0x48   :  { %638 = vmatpush3.msra.mxu0 %v520_v33  ;;  %v487_v39 = vsel %vm451_vm7, %v832_v26, 0.0  ;;  %v84_v40 = vadd.s32 208, %v790_v1  ;;  %v68_v42 = vadd.s32 80, %v790_v1  ;;  %v83_v43 = vadd.s32 200, %v790_v1 }
  0x49   :  { %v535_v41 = vadd.f32 %v503_v34, %v431_v36  ;;  %v67_v44 = vadd.s32 72, %v790_v1  ;;  %v415_v45 = vadd.f32 %v383_v38, %v311_v16  ;;  %v82_v7 = vadd.s32 192, %v790_v1 }
  0x4a   :  { %vm154_vm8 = vcmp.eq.s32.totalorder %v84_v40, %v818_v18  ;;  %vm258_vm9 = vcmp.eq.s32.totalorder %v84_v40, %v822_v20  ;;  %vm362_vm10 = vcmp.eq.s32.totalorder %v84_v40, %v826_v23  ;;  %vm466_vm11 = vcmp.eq.s32.totalorder %v84_v40, %v830_v25 }
  0x4b   :  { %639 = vmatprep.subr.mxu0 %v535_v41  ;;  %v190_v17 = vsel %vm154_vm8, %v820_v19, 0.0  ;;  %v294_v46 = vsel %vm258_vm9, %v824_v21, 0.0  ;;  %v398_v47 = vsel %vm362_vm10, %v828_v24, 0.0  ;;  %v519_v48 = vadd.f32 %v487_v39, %v415_v45 }
  0x4c   :  { %v326_v49 = vadd.f32 %v294_v46, %v190_v17  ;;  %v502_v50 = vsel %vm466_vm11, %v832_v26, 0.0  ;;  %vm138_vm12 = vcmp.eq.s32.totalorder %v68_v42, %v818_v18  ;;  %vm242_vm13 = vcmp.eq.s32.totalorder %v68_v42, %v822_v20 }
  0x4d   :  { %v174_v51 = vsel %vm138_vm12, %v820_v19, 0.0  ;;  %vm346_vm14 = vcmp.eq.s32.totalorder %v68_v42, %v826_v23  ;;  %vm450_vm15 = vcmp.eq.s32.totalorder %v68_v42, %v830_v25  ;;  %640 = vmatpush3.msra.mxu0 %v519_v48  ;;  %v278_v53 = vsel %vm242_vm13, %v824_v21, 0.0 }
  0x4e   :  { %v430_v52 = vadd.f32 %v398_v47, %v326_v49  ;;  %v382_v54 = vsel %vm346_vm14, %v828_v24, 0.0  ;;  %v486_v55 = vsel %vm450_vm15, %v832_v26, 0.0  ;;  %v310_v56 = vadd.f32 %v278_v53, %v174_v51 }
  0x4f   :  { %vm153_vm0 = vcmp.eq.s32.totalorder %v83_v43, %v818_v18  ;;  %vm257_vm1 = vcmp.eq.s32.totalorder %v83_v43, %v822_v20  ;;  %vm361_vm2 = vcmp.eq.s32.totalorder %v83_v43, %v826_v23  ;;  %vm465_vm3 = vcmp.eq.s32.totalorder %v83_v43, %v830_v25 }
  0x50   :  { %v534_v57 = vadd.f32 %v502_v50, %v430_v52  ;;  %v189_v58 = vsel %vm153_vm0, %v820_v19, 0.0  ;;  %v293_v59 = vsel %vm257_vm1, %v824_v21, 0.0  ;;  %v397_v60 = vsel %vm361_vm2, %v828_v24, 0.0 }
  0x51   :  { %v414_v61 = vadd.f32 %v382_v54, %v310_v56  ;;  %v325_v62 = vadd.f32 %v293_v59, %v189_v58  ;;  %vm137_vm4 = vcmp.eq.s32.totalorder %v67_v44, %v818_v18  ;;  %v501_v63 = vsel %vm465_vm3, %v832_v26, 0.0 }
  0x52   :  { %641 = vmatprep.subr.mxu0 %v534_v57  ;;  %v173_v0 = vsel %vm137_vm4, %v820_v19, 0.0  ;;  %vm241_vm5 = vcmp.eq.s32.totalorder %v67_v44, %v822_v20  ;;  %vm345_vm6 = vcmp.eq.s32.totalorder %v67_v44, %v826_v23  ;;  %vm449_vm7 = vcmp.eq.s32.totalorder %v67_v44, %v830_v25 }
  0x53   :  { %v518_v2 = vadd.f32 %v486_v55, %v414_v61  ;;  %v429_v3 = vadd.f32 %v397_v60, %v325_v62  ;;  %v277_v4 = vsel %vm241_vm5, %v824_v21, 0.0  ;;  %v381_v5 = vsel %vm345_vm6, %v828_v24, 0.0 }
  0x54   :  { %v309_v6 = vadd.f32 %v277_v4, %v173_v0  ;;  %v66_v8 = vadd.s32 64, %v790_v1  ;;  %v485_v10 = vsel %vm449_vm7, %v832_v26, 0.0  ;;  %v81_v11 = vadd.s32 184, %v790_v1 }
  0x55   :  { %642 = vmatpush3.msra.mxu0 %v518_v2  ;;  %v533_v9 = vadd.f32 %v501_v63, %v429_v3  ;;  %v65_v14 = vadd.s32 56, %v790_v1  ;;  %vm152_vm8 = vcmp.eq.s32.totalorder %v82_v7, %v818_v18  ;;  %vm256_vm9 = vcmp.eq.s32.totalorder %v82_v7, %v822_v20 }
  0x56   :  { %v413_v15 = vadd.f32 %v381_v5, %v309_v6  ;;  %vm360_vm10 = vcmp.eq.s32.totalorder %v82_v7, %v826_v23  ;;  %v188_v12 = vsel %vm152_vm8, %v820_v19, 0.0  ;;  %v292_v22 = vsel %vm256_vm9, %v824_v21, 0.0 }
  0x57   :  { %643 = vmatprep.subr.mxu0 %v533_v9  ;;  %v396_v27 = vsel %vm360_vm10, %v828_v24, 0.0  ;;  %vm464_vm11 = vcmp.eq.s32.totalorder %v82_v7, %v830_v25  ;;  %v324_v29 = vadd.f32 %v292_v22, %v188_v12  ;;  %vm136_vm12 = vcmp.eq.s32.totalorder %v66_v8, %v818_v18 }
  0x58   :  { %v517_v28 = vadd.f32 %v485_v10, %v413_v15  ;;  %v500_v30 = vsel %vm464_vm11, %v832_v26, 0.0  ;;  %v172_v31 = vsel %vm136_vm12, %v820_v19, 0.0  ;;  %vm240_vm13 = vcmp.eq.s32.totalorder %v66_v8, %v822_v20 }
  0x59   :  { %vm344_vm14 = vcmp.eq.s32.totalorder %v66_v8, %v826_v23  ;;  %vm448_vm15 = vcmp.eq.s32.totalorder %v66_v8, %v830_v25  ;;  %v428_v32 = vadd.f32 %v396_v27, %v324_v29  ;;  %v276_v13 = vsel %vm240_vm13, %v824_v21, 0.0 }
  0x5a   :  { %644 = vmatpush3.msra.mxu0 %v517_v28  ;;  %v380_v33 = vsel %vm344_vm14, %v828_v24, 0.0  ;;  %v484_v34 = vsel %vm448_vm15, %v832_v26, 0.0  ;;  %v308_v35 = vadd.f32 %v276_v13, %v172_v31  ;;  %vm151_vm0 = vcmp.eq.s32.totalorder %v81_v11, %v818_v18 }
  0x5b   :  { %vm255_vm1 = vcmp.eq.s32.totalorder %v81_v11, %v822_v20  ;;  %vm359_vm2 = vcmp.eq.s32.totalorder %v81_v11, %v826_v23  ;;  %v532_v36 = vadd.f32 %v500_v30, %v428_v32  ;;  %v187_v37 = vsel %vm151_vm0, %v820_v19, 0.0 }
  0x5c   :  { %v291_v16 = vsel %vm255_vm1, %v824_v21, 0.0  ;;  %v395_v38 = vsel %vm359_vm2, %v828_v24, 0.0  ;;  %v412_v39 = vadd.f32 %v380_v33, %v308_v35  ;;  %vm463_vm3 = vcmp.eq.s32.totalorder %v81_v11, %v830_v25 }
  0x5d   :  { %v323_v40 = vadd.f32 %v291_v16, %v187_v37  ;;  %vm135_vm4 = vcmp.eq.s32.totalorder %v65_v14, %v818_v18  ;;  %645 = vmatprep.subr.mxu0 %v532_v36  ;;  %v499_v41 = vsel %vm463_vm3, %v832_v26, 0.0  ;;  %vm239_vm5 = vcmp.eq.s32.totalorder %v65_v14, %v822_v20 }
  0x5e   :  { %v171_v42 = vsel %vm135_vm4, %v820_v19, 0.0  ;;  %vm343_vm6 = vcmp.eq.s32.totalorder %v65_v14, %v826_v23  ;;  %v516_v43 = vadd.f32 %v484_v34, %v412_v39  ;;  %v275_v45 = vsel %vm239_vm5, %v824_v21, 0.0 }
  0x5f   :  { %v427_v44 = vadd.f32 %v395_v38, %v323_v40  ;;  %v379_v17 = vsel %vm343_vm6, %v828_v24, 0.0  ;;  %v307_v46 = vadd.f32 %v275_v45, %v171_v42  ;;  %vm447_vm7 = vcmp.eq.s32.totalorder %v65_v14, %v830_v25 }
  0x60   :  { %v80_v47 = vadd.s32 176, %v790_v1  ;;  %v64_v48 = vadd.s32 48, %v790_v1  ;;  %646 = vmatpush3.msra.mxu0 %v516_v43  ;;  %v483_v50 = vsel %vm447_vm7, %v832_v26, 0.0  ;;  %v79_v51 = vadd.s32 168, %v790_v1 }
  0x61   :  { %v531_v49 = vadd.f32 %v499_v41, %v427_v44  ;;  %v63_v52 = vadd.s32 40, %v790_v1  ;;  %v411_v53 = vadd.f32 %v379_v17, %v307_v46  ;;  %v78_v27 = vadd.s32 160, %v790_v1 }
  0x62   :  { %vm150_vm8 = vcmp.eq.s32.totalorder %v80_v47, %v818_v18  ;;  %vm254_vm9 = vcmp.eq.s32.totalorder %v80_v47, %v822_v20  ;;  %vm358_vm10 = vcmp.eq.s32.totalorder %v80_v47, %v826_v23  ;;  %vm462_vm11 = vcmp.eq.s32.totalorder %v80_v47, %v830_v25 }
  0x63   :  { %647 = vmatprep.subr.mxu0 %v531_v49  ;;  %v186_v54 = vsel %vm150_vm8, %v820_v19, 0.0  ;;  %v290_v55 = vsel %vm254_vm9, %v824_v21, 0.0  ;;  %v394_v56 = vsel %vm358_vm10, %v828_v24, 0.0  ;;  %v515_v57 = vadd.f32 %v483_v50, %v411_v53 }
  0x64   :  { %v322_v58 = vadd.f32 %v290_v55, %v186_v54  ;;  %v498_v59 = vsel %vm462_vm11, %v832_v26, 0.0  ;;  %vm134_vm12 = vcmp.eq.s32.totalorder %v64_v48, %v818_v18  ;;  %vm238_vm13 = vcmp.eq.s32.totalorder %v64_v48, %v822_v20 }
  0x65   :  { %v170_v60 = vsel %vm134_vm12, %v820_v19, 0.0  ;;  %vm342_vm14 = vcmp.eq.s32.totalorder %v64_v48, %v826_v23  ;;  %vm446_vm15 = vcmp.eq.s32.totalorder %v64_v48, %v830_v25  ;;  %648 = vmatpush3.msra.mxu0 %v515_v57  ;;  %v274_v62 = vsel %vm238_vm13, %v824_v21, 0.0 }
  0x66   :  { %v426_v61 = vadd.f32 %v394_v56, %v322_v58  ;;  %v378_v63 = vsel %vm342_vm14, %v828_v24, 0.0  ;;  %v482_v0 = vsel %vm446_vm15, %v832_v26, 0.0  ;;  %v306_v2 = vadd.f32 %v274_v62, %v170_v60 }
  0x67   :  { %vm149_vm0 = vcmp.eq.s32.totalorder %v79_v51, %v818_v18  ;;  %vm253_vm1 = vcmp.eq.s32.totalorder %v79_v51, %v822_v20  ;;  %vm357_vm2 = vcmp.eq.s32.totalorder %v79_v51, %v826_v23  ;;  %vm461_vm3 = vcmp.eq.s32.totalorder %v79_v51, %v830_v25 }
  0x68   :  { %v530_v3 = vadd.f32 %v498_v59, %v426_v61  ;;  %v185_v4 = vsel %vm149_vm0, %v820_v19, 0.0  ;;  %v289_v5 = vsel %vm253_vm1, %v824_v21, 0.0  ;;  %v393_v6 = vsel %vm357_vm2, %v828_v24, 0.0 }
  0x69   :  { %v410_v7 = vadd.f32 %v378_v63, %v306_v2  ;;  %v321_v8 = vadd.f32 %v289_v5, %v185_v4  ;;  %vm133_vm4 = vcmp.eq.s32.totalorder %v63_v52, %v818_v18  ;;  %v497_v9 = vsel %vm461_vm3, %v832_v26, 0.0 }
  0x6a   :  { %649 = vmatprep.subr.mxu0 %v530_v3  ;;  %v169_v10 = vsel %vm133_vm4, %v820_v19, 0.0  ;;  %vm237_vm5 = vcmp.eq.s32.totalorder %v63_v52, %v822_v20  ;;  %vm341_vm6 = vcmp.eq.s32.totalorder %v63_v52, %v826_v23  ;;  %vm445_vm7 = vcmp.eq.s32.totalorder %v63_v52, %v830_v25 }
  0x6b   :  { %v514_v11 = vadd.f32 %v482_v0, %v410_v7  ;;  %v425_v14 = vadd.f32 %v393_v6, %v321_v8  ;;  %v273_v15 = vsel %vm237_vm5, %v824_v21, 0.0  ;;  %v377_v12 = vsel %vm341_vm6, %v828_v24, 0.0 }
  0x6c   :  { %v305_v22 = vadd.f32 %v273_v15, %v169_v10  ;;  %v62_v28 = vadd.s32 32, %v790_v1  ;;  %v481_v30 = vsel %vm445_vm7, %v832_v26, 0.0  ;;  %v77_v31 = vadd.s32 152, %v790_v1 }
  0x6d   :  { %650 = vmatpush3.msra.mxu0 %v514_v11  ;;  %v529_v29 = vadd.f32 %v497_v9, %v425_v14  ;;  %v61_v32 = vadd.s32 24, %v790_v1  ;;  %vm148_vm8 = vcmp.eq.s32.totalorder %v78_v27, %v818_v18  ;;  %vm252_vm9 = vcmp.eq.s32.totalorder %v78_v27, %v822_v20 }
  0x6e   :  { %v409_v13 = vadd.f32 %v377_v12, %v305_v22  ;;  %vm356_vm10 = vcmp.eq.s32.totalorder %v78_v27, %v826_v23  ;;  %v184_v33 = vsel %vm148_vm8, %v820_v19, 0.0  ;;  %v288_v34 = vsel %vm252_vm9, %v824_v21, 0.0 }
  0x6f   :  { %651 = vmatprep.subr.mxu0 %v529_v29  ;;  %v392_v35 = vsel %vm356_vm10, %v828_v24, 0.0  ;;  %vm460_vm11 = vcmp.eq.s32.totalorder %v78_v27, %v830_v25  ;;  %v320_v37 = vadd.f32 %v288_v34, %v184_v33  ;;  %vm132_vm12 = vcmp.eq.s32.totalorder %v62_v28, %v818_v18 }
  0x70   :  { %v513_v36 = vadd.f32 %v481_v30, %v409_v13  ;;  %v496_v16 = vsel %vm460_vm11, %v832_v26, 0.0  ;;  %v168_v38 = vsel %vm132_vm12, %v820_v19, 0.0  ;;  %vm236_vm13 = vcmp.eq.s32.totalorder %v62_v28, %v822_v20 }
  0x71   :  { %vm340_vm14 = vcmp.eq.s32.totalorder %v62_v28, %v826_v23  ;;  %vm444_vm15 = vcmp.eq.s32.totalorder %v62_v28, %v830_v25  ;;  %v424_v39 = vadd.f32 %v392_v35, %v320_v37  ;;  %v272_v40 = vsel %vm236_vm13, %v824_v21, 0.0 }
  0x72   :  { %652 = vmatpush3.msra.mxu0 %v513_v36  ;;  %v376_v41 = vsel %vm340_vm14, %v828_v24, 0.0  ;;  %v480_v42 = vsel %vm444_vm15, %v832_v26, 0.0  ;;  %v304_v43 = vadd.f32 %v272_v40, %v168_v38  ;;  %vm147_vm0 = vcmp.eq.s32.totalorder %v77_v31, %v818_v18 }
  0x73   :  { %vm251_vm1 = vcmp.eq.s32.totalorder %v77_v31, %v822_v20  ;;  %vm355_vm2 = vcmp.eq.s32.totalorder %v77_v31, %v826_v23  ;;  %v528_v44 = vadd.f32 %v496_v16, %v424_v39  ;;  %v183_v45 = vsel %vm147_vm0, %v820_v19, 0.0 }
  0x74   :  { %v287_v17 = vsel %vm251_vm1, %v824_v21, 0.0  ;;  %v391_v46 = vsel %vm355_vm2, %v828_v24, 0.0  ;;  %v408_v47 = vadd.f32 %v376_v41, %v304_v43  ;;  %vm459_vm3 = vcmp.eq.s32.totalorder %v77_v31, %v830_v25 }
  0x75   :  { %v319_v48 = vadd.f32 %v287_v17, %v183_v45  ;;  %vm131_vm4 = vcmp.eq.s32.totalorder %v61_v32, %v818_v18  ;;  %653 = vmatprep.subr.mxu0 %v528_v44  ;;  %v495_v49 = vsel %vm459_vm3, %v832_v26, 0.0  ;;  %vm235_vm5 = vcmp.eq.s32.totalorder %v61_v32, %v822_v20 }
  0x76   :  { %v167_v50 = vsel %vm131_vm4, %v820_v19, 0.0  ;;  %vm339_vm6 = vcmp.eq.s32.totalorder %v61_v32, %v826_v23  ;;  %v512_v51 = vadd.f32 %v480_v42, %v408_v47  ;;  %v271_v53 = vsel %vm235_vm5, %v824_v21, 0.0 }
  0x77   :  { %v423_v52 = vadd.f32 %v391_v46, %v319_v48  ;;  %v375_v54 = vsel %vm339_vm6, %v828_v24, 0.0  ;;  %v303_v55 = vadd.f32 %v271_v53, %v167_v50  ;;  %vm443_vm7 = vcmp.eq.s32.totalorder %v61_v32, %v830_v25 }
  0x78   :  { %v76_v56 = vadd.s32 144, %v790_v1  ;;  %v60_v57 = vadd.s32 16, %v790_v1  ;;  %654 = vmatpush3.msra.mxu0 %v512_v51  ;;  %v479_v59 = vsel %vm443_vm7, %v832_v26, 0.0  ;;  %v75_v60 = vadd.s32 136, %v790_v1 }
  0x79   :  { %v527_v58 = vadd.f32 %v495_v49, %v423_v52  ;;  %v59_v61 = vadd.s32 8, %v790_v1  ;;  %v407_v62 = vadd.f32 %v375_v54, %v303_v55  ;;  %v74_v35 = vadd.s32 128, %v790_v1  ;;  %v541_v49 = vld [vmem:[#allocation7] sm:$0xff] }
  0x7a   :  { %vm146_vm8 = vcmp.eq.s32.totalorder %v76_v56, %v818_v18  ;;  %vm250_vm9 = vcmp.eq.s32.totalorder %v76_v56, %v822_v20  ;;  %vm354_vm10 = vcmp.eq.s32.totalorder %v76_v56, %v826_v23  ;;  %vm458_vm11 = vcmp.eq.s32.totalorder %v76_v56, %v830_v25 }
  0x7b   :  { %655 = vmatprep.subr.mxu0 %v527_v58  ;;  %v182_v63 = vsel %vm146_vm8, %v820_v19, 0.0  ;;  %v286_v0 = vsel %vm250_vm9, %v824_v21, 0.0  ;;  %v390_v2 = vsel %vm354_vm10, %v828_v24, 0.0  ;;  %v511_v3 = vadd.f32 %v479_v59, %v407_v62 }
  0x7c   :  { %v318_v4 = vadd.f32 %v286_v0, %v182_v63  ;;  %v494_v5 = vsel %vm458_vm11, %v832_v26, 0.0  ;;  %vm130_vm12 = vcmp.eq.s32.totalorder %v60_v57, %v818_v18  ;;  %vm234_vm13 = vcmp.eq.s32.totalorder %v60_v57, %v822_v20 }
  0x7d   :  { %v166_v6 = vsel %vm130_vm12, %v820_v19, 0.0  ;;  %vm338_vm14 = vcmp.eq.s32.totalorder %v60_v57, %v826_v23  ;;  %vm442_vm15 = vcmp.eq.s32.totalorder %v60_v57, %v830_v25  ;;  %656 = vmatpush3.msra.mxu0 %v511_v3  ;;  %v270_v8 = vsel %vm234_vm13, %v824_v21, 0.0 }
  0x7e   :  { %v422_v7 = vadd.f32 %v390_v2, %v318_v4  ;;  %v374_v9 = vsel %vm338_vm14, %v828_v24, 0.0  ;;  %v478_v10 = vsel %vm442_vm15, %v832_v26, 0.0  ;;  %v302_v11 = vadd.f32 %v270_v8, %v166_v6 }
  0x7f   :  { %vm145_vm0 = vcmp.eq.s32.totalorder %v75_v60, %v818_v18  ;;  %vm249_vm1 = vcmp.eq.s32.totalorder %v75_v60, %v822_v20  ;;  %vm353_vm2 = vcmp.eq.s32.totalorder %v75_v60, %v826_v23  ;;  %vm457_vm3 = vcmp.eq.s32.totalorder %v75_v60, %v830_v25 }
  0x80   :  { %v526_v14 = vadd.f32 %v494_v5, %v422_v7  ;;  %v181_v15 = vsel %vm145_vm0, %v820_v19, 0.0  ;;  %v285_v12 = vsel %vm249_vm1, %v824_v21, 0.0  ;;  %v389_v22 = vsel %vm353_vm2, %v828_v24, 0.0 }
  0x81   :  { %v406_v27 = vadd.f32 %v374_v9, %v302_v11  ;;  %v317_v28 = vadd.f32 %v285_v12, %v181_v15  ;;  %vm129_vm4 = vcmp.eq.s32.totalorder %v59_v61, %v818_v18  ;;  %v493_v29 = vsel %vm457_vm3, %v832_v26, 0.0 }
  0x82   :  { %657 = vmatprep.subr.mxu0 %v526_v14  ;;  %v165_v30 = vsel %vm129_vm4, %v820_v19, 0.0  ;;  %vm233_vm5 = vcmp.eq.s32.totalorder %v59_v61, %v822_v20  ;;  %vm337_vm6 = vcmp.eq.s32.totalorder %v59_v61, %v826_v23  ;;  %vm441_vm7 = vcmp.eq.s32.totalorder %v59_v61, %v830_v25 }
  0x83   :  { %v510_v31 = vadd.f32 %v478_v10, %v406_v27  ;;  %v421_v32 = vadd.f32 %v389_v22, %v317_v28  ;;  %v269_v13 = vsel %vm233_vm5, %v824_v21, 0.0  ;;  %v373_v33 = vsel %vm337_vm6, %v828_v24, 0.0 }
  0x84   :  { %v301_v34 = vadd.f32 %v269_v13, %v165_v30  ;;  %vm128_vm8 = vcmp.eq.s32.totalorder %v790_v1, %v818_v18  ;;  %v477_v37 = vsel %vm441_vm7, %v832_v26, 0.0  ;;  %vm232_vm9 = vcmp.eq.s32.totalorder %v790_v1, %v822_v20 }
  0x85   :  { %658 = vmatpush3.msra.mxu0 %v510_v31  ;;  %v525_v36 = vadd.f32 %v493_v29, %v421_v32  ;;  %v164_v16 = vsel %vm128_vm8, %v820_v19, 0.0  ;;  %vm144_vm10 = vcmp.eq.s32.totalorder %v74_v35, %v818_v18  ;;  %vm248_vm11 = vcmp.eq.s32.totalorder %v74_v35, %v822_v20 }
  0x86   :  { %v405_v38 = vadd.f32 %v373_v33, %v301_v34  ;;  %vm352_vm12 = vcmp.eq.s32.totalorder %v74_v35, %v826_v23  ;;  %v180_v39 = vsel %vm144_vm10, %v820_v19, 0.0  ;;  %v284_v40 = vsel %vm248_vm11, %v824_v21, 0.0 }
  0x87   :  { %659 = vmatprep.subr.mxu0 %v525_v36  ;;  %v388_v41 = vsel %vm352_vm12, %v828_v24, 0.0  ;;  %vm456_vm13 = vcmp.eq.s32.totalorder %v74_v35, %v830_v25  ;;  %v316_v43 = vadd.f32 %v284_v40, %v180_v39  ;;  %v268_v44 = vsel %vm232_vm9, %v824_v21, 0.0 }
  0x88   :  { %v509_v42 = vadd.f32 %v477_v37, %v405_v38  ;;  %v492_v45 = vsel %vm456_vm13, %v832_v26, 0.0  ;;  %v300_v18 = vadd.f32 %v268_v44, %v164_v16  ;;  %vm336_vm14 = vcmp.eq.s32.totalorder %v790_v1, %v826_v23 }
  0x89   :  { %vm440_vm15 = vcmp.eq.s32.totalorder %v790_v1, %v830_v25  ;;  %v420_v19 = vadd.f32 %v388_v41, %v316_v43  ;;  %v372_v20 = vsel %vm336_vm14, %v828_v24, 0.0 }
  0x8a   :  { %660 = vmatpush3.msra.mxu0 %v509_v42  ;;  %v476_v17 = vsel %vm440_vm15, %v832_v26, 0.0  ;;  %v404_v46 = vadd.f32 %v372_v20, %v300_v18 }
  0x8b   :  { %v524_v47 = vadd.f32 %v492_v45, %v420_v19 }
  0x8c   :  { %v508_v48 = vadd.f32 %v476_v17, %v404_v46 }
  0x8d   :  { %661 = vmatprep.subr.mxu0 %v524_v47 }
  0x8e   :  { %662 = vmatpush3.msra.mxu0 %v508_v48 }
  0x8f   :  { %608 = vmatmul.mubr.f32.vlgmr.msra.gmra.mxu0 %v541_v49 }
 0x14f   :  { %v663_v21 = vpop.f32.mrf.mxu0 }
 0x151   :  { %v664_v50 = vpop.f32.mrf.mxu0 }
 0x152   :  { %v665_v23 = vadd.f32 %v664_v50, %v663_v21 }
 0x154   :  { %614 = vst [vmem:[#allocation8] sm:$0xff] %v665_v23 }
 0x155   :  { %742 = shalt.err (!%p739_p5)
}
 0x156   :  { %624 = dma.vmem_to_hbm [thread:$0]  %s622_s2, 128, %s1145_s3, [#allocation4]  }
 0x157   :  { %755 = dma.done.wait [#allocation4], 128  }
 0x158   :  { %756 = vsyncadd [#allocation4], 4294967168 }
 0x159   :  { %628 = vsyncpa [#allocation3], 1 }
 0x15a   :  { %629 = vsyncpa [#allocation6], 1 }
 0x15b   :  { %630 = vsyncpa [#allocation4], 1 }

</bundles_post_ra>
